<compile_context>
chip_gen: v7x
topology: tpu7x:2x2x1
jax: 0.10.0
libtpu: 0.0.40
codegen_flags: <defaults>
</compile_context>

<pallas_src>
import numpy as np
import jax
import jax.numpy as jnp
from jax import lax
from jax.experimental import pallas as pl
from jax.experimental.pallas import tpu as pltpu

# ---- static model config (matches module __init__ at small sizes) ----
B, S = 2, 8          # batch, sequence length
IN_SIZE = 16         # input_size
ATT = 32             # att_size (d_model)
FF = 64              # output_size -> dim_feedforward
NHEAD = 2            # nhead
DH = ATT // NHEAD    # head dim
G = B * NHEAD        # independent (batch, head) attention groups
HORIZON = 4          # temporal_horizon (band width of the attention mask)
EPS = 1e-5
NEG = -1e30          # finite "minus infinity"

# weight-slab row layout (all row offsets 8-aligned; weights stored (in, out))
W_EMB_R, W_QKV_R, W_O_R, W_FF1_R, W_FF2_R, MASK_R, PE_R = 0, 16, 48, 80, 112, 176, 208
W_ROWS, W_COLS = 224, 128
V_ROWS, V_COLS = 16, 128   # bias / LayerNorm slab (one vector per row)


def _layernorm(x, g, b):
    mu = jnp.mean(x, axis=-1, keepdims=True)
    var = jnp.mean((x - mu) ** 2, axis=-1, keepdims=True)
    return (x - mu) * lax.rsqrt(var + EPS) * g + b


def encoder_kernel(x_ref, w_ref, v_ref, out_ref):
    x = x_ref[...]                                   # (B*S, IN_SIZE)

    # ---- static slices of the packed slabs (free) ----
    w_emb = w_ref[W_EMB_R:W_EMB_R + IN_SIZE, 0:ATT]          # (IN, ATT)
    w_qkv = w_ref[W_QKV_R:W_QKV_R + ATT, 0:3 * ATT]          # (ATT, 3*ATT), Q pre-scaled
    w_o   = w_ref[W_O_R:W_O_R + ATT, 0:ATT]                  # (ATT, ATT)
    w_ff1 = w_ref[W_FF1_R:W_FF1_R + ATT, 0:FF]               # (ATT, FF)
    w_ff2 = w_ref[W_FF2_R:W_FF2_R + FF, 0:ATT]               # (FF, ATT)
    mask  = w_ref[MASK_R:MASK_R + G * S, 0:G * S]            # (G*S, G*S) block band mask
    pe    = w_ref[PE_R:PE_R + B * S, 0:ATT]                  # (B*S, ATT), pre-scaled+tiled

    b_emb = v_ref[0:1, 0:ATT]
    b_qkv = v_ref[1:2, 0:3 * ATT]                            # Q part pre-scaled
    b_o   = v_ref[2:3, 0:ATT]
    ln1_g = v_ref[3:4, 0:ATT]
    ln1_b = v_ref[4:5, 0:ATT]
    b_ff1 = v_ref[5:6, 0:FF]
    b_ff2 = v_ref[6:7, 0:ATT]
    ln2_g = v_ref[7:8, 0:ATT]
    ln2_b = v_ref[8:9, 0:ATT]
    lnf_g = v_ref[9:10, 0:ATT]
    lnf_b = v_ref[10:11, 0:ATT]

    # linear embedding + positional encoding (sum fusion)
    h = jnp.dot(x, w_emb, preferred_element_type=jnp.float32) + b_emb + pe   # (B*S, ATT)

    # ---- self-attention (single encoder layer) ----
    qkv = jnp.dot(h, w_qkv, preferred_element_type=jnp.float32) + b_qkv      # (B*S, 3*ATT)
    q = qkv[:, 0 * ATT:1 * ATT]
    k = qkv[:, 1 * ATT:2 * ATT]
    v = qkv[:, 2 * ATT:3 * ATT]

    # stack (batch, head) groups along sublanes -> (G*S, DH)
    def stack_heads(m):
        return jnp.concatenate(
            [m[b * S:(b + 1) * S, hd * DH:(hd + 1) * DH]
             for b in range(B) for hd in range(NHEAD)], axis=0)

    qs = stack_heads(q)                                       # (G*S, DH)
    ks = stack_heads(k)
    vs = stack_heads(v)

    # one score matmul for all (batch, head) groups; cross-group blocks masked
    s = lax.dot_general(qs, ks, (((1,), (1,)), ((), ())),
                        preferred_element_type=jnp.float32)    # (G*S, G*S)
    s = s + mask
    s = s - jnp.max(s, axis=-1, keepdims=True)
    p = jnp.exp(s)
    p = p * pl.reciprocal(jnp.sum(p, axis=-1, keepdims=True), approx=True)
    o = jnp.dot(p, vs, preferred_element_type=jnp.float32)     # (G*S, DH)

    # unstack groups back to (B*S, ATT) = heads concatenated along lanes
    attn = jnp.concatenate(
        [jnp.concatenate([o[(b * NHEAD + hd) * S:(b * NHEAD + hd + 1) * S, :]
                          for hd in range(NHEAD)], axis=1)
         for b in range(B)], axis=0)
    attn = jnp.dot(attn, w_o, preferred_element_type=jnp.float32) + b_o

    # residual + norm1
    h = _layernorm(h + attn, ln1_g, ln1_b)

    # feed-forward (ReLU)
    ff = jnp.dot(h, w_ff1, preferred_element_type=jnp.float32) + b_ff1
    ff = jnp.maximum(ff, 0.0)
    ff = jnp.dot(ff, w_ff2, preferred_element_type=jnp.float32) + b_ff2

    # residual + norm2, then final encoder norm
    h = _layernorm(h + ff, ln2_g, ln2_b)
    h = _layernorm(h, lnf_g, lnf_b)

    out_ref[...] = h


def transformer_encoder(x, wslab, vslab):
    x2d = x.reshape(B * S, IN_SIZE)
    vmem_spec = pl.BlockSpec(memory_space=pltpu.MemorySpace.VMEM)
    out = pl.pallas_call(
        encoder_kernel,
        out_shape=jax.ShapeDtypeStruct((B * S, ATT), jnp.float32),
        in_specs=[vmem_spec, vmem_spec, vmem_spec],
        out_specs=vmem_spec,
        compiler_params=pltpu.CompilerParams(vmem_limit_bytes=2 * 1024 * 1024),
        cost_estimate=pl.CostEstimate(flops=350_000, transcendentals=1_200,
                                      bytes_accessed=140_000),
    )(x2d, wslab, vslab)
    return out.reshape(B, S, ATT)


def make_block_mask():
    # generate_square_subsequent_mask(S, length=HORIZON): banded lower-tri
    # {0, NEG}, replicated on the diagonal blocks of the (batch, head)-stacked
    # score matrix; everything off the block diagonal is masked.
    i = np.arange(S)[:, None]
    j = np.arange(S)[None, :]
    band = np.where((j <= i) & (j >= i - HORIZON), 0.0, NEG).astype(np.float32)
    big = np.full((G * S, G * S), NEG, np.float32)
    for g in range(G):
        big[g * S:(g + 1) * S, g * S:(g + 1) * S] = band
    return big


def make_pe_tiled():
    # PositionalEncoding buffer, scaled by scale_factor=1e-5 and tiled over batch
    pos = np.arange(S, dtype=np.float32)[:, None]
    div = np.exp(np.arange(0, ATT, 2, dtype=np.float32) * (-np.log(10000.0) / ATT))
    pe = np.zeros((S, ATT), np.float32)
    pe[:, 0::2] = np.sin(pos * div)
    pe[:, 1::2] = np.cos(pos * div)
    return np.tile(np.float32(1e-5) * pe, (B, 1))              # (B*S, ATT)


def make_param_slabs(key):
    ks = jax.random.split(key, 8)
    f32 = np.float32

    def rnd(k, shape):
        return np.asarray(0.1 * jax.random.normal(k, shape, jnp.float32))

    # PyTorch-style (out_features, in_features) parameters
    w_emb = rnd(ks[0], (ATT, IN_SIZE))
    b_emb = rnd(ks[1], (ATT,))
    w_qkv = rnd(ks[2], (3 * ATT, ATT))       # rows ordered [Wq; Wk; Wv]
    b_qkv = rnd(ks[3], (3 * ATT,))
    w_o = rnd(ks[4], (ATT, ATT))
    b_o = rnd(ks[5], (ATT,))
    w_ff1 = rnd(ks[6], (FF, ATT))
    b_ff1 = np.zeros((FF,), f32)
    w_ff2 = rnd(ks[7], (ATT, FF))
    b_ff2 = np.zeros((ATT,), f32)
    ln1_g = np.ones((ATT,), f32); ln1_b = np.zeros((ATT,), f32)
    ln2_g = np.ones((ATT,), f32); ln2_b = np.zeros((ATT,), f32)
    lnf_g = np.ones((ATT,), f32); lnf_b = np.zeros((ATT,), f32)

    # fold attention scale 1/sqrt(DH) into the Q projection (host-side, free)
    inv_sqrt_dh = np.float32(1.0 / np.sqrt(DH))
    w_qkv = w_qkv.copy(); b_qkv = b_qkv.copy()
    w_qkv[:ATT, :] *= inv_sqrt_dh
    b_qkv[:ATT] *= inv_sqrt_dh

    # pre-transpose weights to (in, out) and pack into one slab (+mask, +PE)
    wslab = np.zeros((W_ROWS, W_COLS), f32)
    wslab[W_EMB_R:W_EMB_R + IN_SIZE, 0:ATT] = w_emb.T
    wslab[W_QKV_R:W_QKV_R + ATT, 0:3 * ATT] = w_qkv.T
    wslab[W_O_R:W_O_R + ATT, 0:ATT] = w_o.T
    wslab[W_FF1_R:W_FF1_R + ATT, 0:FF] = w_ff1.T
    wslab[W_FF2_R:W_FF2_R + FF, 0:ATT] = w_ff2.T
    wslab[MASK_R:MASK_R + G * S, 0:G * S] = make_block_mask()
    wslab[PE_R:PE_R + B * S, 0:ATT] = make_pe_tiled()

    # pack all biases / LayerNorm params into one (16, 128) slab
    vslab = np.zeros((V_ROWS, V_COLS), f32)
    vslab[0, :ATT] = b_emb
    vslab[1, :3 * ATT] = b_qkv
    vslab[2, :ATT] = b_o
    vslab[3, :ATT] = ln1_g
    vslab[4, :ATT] = ln1_b
    vslab[5, :FF] = b_ff1
    vslab[6, :ATT] = b_ff2
    vslab[7, :ATT] = ln2_g
    vslab[8, :ATT] = ln2_b
    vslab[9, :ATT] = lnf_g
    vslab[10, :ATT] = lnf_b

    return jnp.asarray(wslab), jnp.asarray(vslab)


if __name__ == "__main__":
    key = jax.random.PRNGKey(0)
    k_x, k_p = jax.random.split(key)
    x = jax.random.normal(k_x, (B, S, IN_SIZE), jnp.float32)

    wslab, vslab = make_param_slabs(k_p)

    out = transformer_encoder(x, wslab, vslab)
    out = jax.block_until_ready(out)
    assert out.shape == (B, S, ATT)
    assert bool(jnp.all(jnp.isfinite(out)))
    print("KERNEL_OK")
</pallas_src>

<mosaic_0001>
module attributes {stable_mosaic.version = 11 : i64} {
  func.func @encoder_kernel(%arg0: memref<16x16xf32, #tpu.memory_space<vmem>>, %arg1: memref<224x128xf32, #tpu.memory_space<vmem>>, %arg2: memref<16x128xf32, #tpu.memory_space<vmem>>, %arg3: memref<16x32xf32, #tpu.memory_space<vmem>>) attributes {dimension_semantics = [], scalar_prefetch = 0 : i64, scratch_operands = 0 : i64, tpu.core_type = #tpu.core_type<tc>} {
    %c0 = arith.constant 0 : index
    %c0_0 = arith.constant 0 : index
    %0 = vector.load %arg0[%c0, %c0_0] : memref<16x16xf32, #tpu.memory_space<vmem>>, vector<16x16xf32>
    %c0_1 = arith.constant 0 : index
    %c0_2 = arith.constant 0 : index
    %1 = vector.load %arg1[%c0_1, %c0_2] : memref<224x128xf32, #tpu.memory_space<vmem>>, vector<16x32xf32>
    %c16 = arith.constant 16 : index
    %c0_3 = arith.constant 0 : index
    %2 = vector.load %arg1[%c16, %c0_3] : memref<224x128xf32, #tpu.memory_space<vmem>>, vector<32x96xf32>
    %c48 = arith.constant 48 : index
    %c0_4 = arith.constant 0 : index
    %3 = vector.load %arg1[%c48, %c0_4] : memref<224x128xf32, #tpu.memory_space<vmem>>, vector<32x32xf32>
    %c80 = arith.constant 80 : index
    %c0_5 = arith.constant 0 : index
    %4 = vector.load %arg1[%c80, %c0_5] : memref<224x128xf32, #tpu.memory_space<vmem>>, vector<32x64xf32>
    %c112 = arith.constant 112 : index
    %c0_6 = arith.constant 0 : index
    %5 = vector.load %arg1[%c112, %c0_6] : memref<224x128xf32, #tpu.memory_space<vmem>>, vector<64x32xf32>
    %c176 = arith.constant 176 : index
    %c0_7 = arith.constant 0 : index
    %6 = vector.load %arg1[%c176, %c0_7] : memref<224x128xf32, #tpu.memory_space<vmem>>, vector<32x32xf32>
    %c208 = arith.constant 208 : index
    %c0_8 = arith.constant 0 : index
    %7 = vector.load %arg1[%c208, %c0_8] : memref<224x128xf32, #tpu.memory_space<vmem>>, vector<16x32xf32>
    %c0_9 = arith.constant 0 : index
    %c0_10 = arith.constant 0 : index
    %8 = vector.load %arg2[%c0_9, %c0_10] : memref<16x128xf32, #tpu.memory_space<vmem>>, vector<1x32xf32>
    %c1 = arith.constant 1 : index
    %c0_11 = arith.constant 0 : index
    %9 = vector.load %arg2[%c1, %c0_11] : memref<16x128xf32, #tpu.memory_space<vmem>>, vector<1x96xf32>
    %c2 = arith.constant 2 : index
    %c0_12 = arith.constant 0 : index
    %10 = vector.load %arg2[%c2, %c0_12] : memref<16x128xf32, #tpu.memory_space<vmem>>, vector<1x32xf32>
    %c3 = arith.constant 3 : index
    %c0_13 = arith.constant 0 : index
    %11 = vector.load %arg2[%c3, %c0_13] : memref<16x128xf32, #tpu.memory_space<vmem>>, vector<1x32xf32>
    %c4 = arith.constant 4 : index
    %c0_14 = arith.constant 0 : index
    %12 = vector.load %arg2[%c4, %c0_14] : memref<16x128xf32, #tpu.memory_space<vmem>>, vector<1x32xf32>
    %c5 = arith.constant 5 : index
    %c0_15 = arith.constant 0 : index
    %13 = vector.load %arg2[%c5, %c0_15] : memref<16x128xf32, #tpu.memory_space<vmem>>, vector<1x64xf32>
    %c6 = arith.constant 6 : index
    %c0_16 = arith.constant 0 : index
    %14 = vector.load %arg2[%c6, %c0_16] : memref<16x128xf32, #tpu.memory_space<vmem>>, vector<1x32xf32>
    %c7 = arith.constant 7 : index
    %c0_17 = arith.constant 0 : index
    %15 = vector.load %arg2[%c7, %c0_17] : memref<16x128xf32, #tpu.memory_space<vmem>>, vector<1x32xf32>
    %c8 = arith.constant 8 : index
    %c0_18 = arith.constant 0 : index
    %16 = vector.load %arg2[%c8, %c0_18] : memref<16x128xf32, #tpu.memory_space<vmem>>, vector<1x32xf32>
    %c9 = arith.constant 9 : index
    %c0_19 = arith.constant 0 : index
    %17 = vector.load %arg2[%c9, %c0_19] : memref<16x128xf32, #tpu.memory_space<vmem>>, vector<1x32xf32>
    %c10 = arith.constant 10 : index
    %c0_20 = arith.constant 0 : index
    %18 = vector.load %arg2[%c10, %c0_20] : memref<16x128xf32, #tpu.memory_space<vmem>>, vector<1x32xf32>
    %cst = arith.constant dense<0.000000e+00> : vector<16x32xf32>
    %19 = tpu.matmul %0, %1, %cst {dimension_numbers = #tpu.dot_dimension_numbers<[1], [0], [0], [1], [0, 0, 1, 1], [], []>} : vector<16x16xf32>, vector<16x32xf32>, vector<16x32xf32> -> vector<16x32xf32>
    %20 = vector.broadcast %8 : vector<1x32xf32> to vector<16x32xf32>
    %21 = arith.addf %19, %20 : vector<16x32xf32>
    %22 = arith.addf %21, %7 : vector<16x32xf32>
    %cst_21 = arith.constant dense<0.000000e+00> : vector<16x96xf32>
    %23 = tpu.matmul %22, %2, %cst_21 {dimension_numbers = #tpu.dot_dimension_numbers<[1], [0], [0], [1], [0, 0, 1, 1], [], []>} : vector<16x32xf32>, vector<32x96xf32>, vector<16x96xf32> -> vector<16x96xf32>
    %24 = vector.broadcast %9 : vector<1x96xf32> to vector<16x96xf32>
    %25 = arith.addf %23, %24 : vector<16x96xf32>
    %26 = vector.extract_strided_slice %25 {offsets = [0, 0], sizes = [16, 32], strides = [1, 1]} : vector<16x96xf32> to vector<16x32xf32>
    %27 = vector.extract_strided_slice %25 {offsets = [0, 32], sizes = [16, 32], strides = [1, 1]} : vector<16x96xf32> to vector<16x32xf32>
    %28 = vector.extract_strided_slice %25 {offsets = [0, 64], sizes = [16, 32], strides = [1, 1]} : vector<16x96xf32> to vector<16x32xf32>
    %29 = vector.extract_strided_slice %26 {offsets = [0, 0], sizes = [8, 16], strides = [1, 1]} : vector<16x32xf32> to vector<8x16xf32>
    %30 = vector.extract_strided_slice %26 {offsets = [0, 16], sizes = [8, 16], strides = [1, 1]} : vector<16x32xf32> to vector<8x16xf32>
    %31 = vector.extract_strided_slice %26 {offsets = [8, 0], sizes = [8, 16], strides = [1, 1]} : vector<16x32xf32> to vector<8x16xf32>
    %32 = vector.extract_strided_slice %26 {offsets = [8, 16], sizes = [8, 16], strides = [1, 1]} : vector<16x32xf32> to vector<8x16xf32>
    %33 = tpu.concatenate %29, %30, %31, %32 in 0 : vector<8x16xf32>, vector<8x16xf32>, vector<8x16xf32>, vector<8x16xf32> -> vector<32x16xf32>
    %34 = vector.extract_strided_slice %27 {offsets = [0, 0], sizes = [8, 16], strides = [1, 1]} : vector<16x32xf32> to vector<8x16xf32>
    %35 = vector.extract_strided_slice %27 {offsets = [0, 16], sizes = [8, 16], strides = [1, 1]} : vector<16x32xf32> to vector<8x16xf32>
    %36 = vector.extract_strided_slice %27 {offsets = [8, 0], sizes = [8, 16], strides = [1, 1]} : vector<16x32xf32> to vector<8x16xf32>
    %37 = vector.extract_strided_slice %27 {offsets = [8, 16], sizes = [8, 16], strides = [1, 1]} : vector<16x32xf32> to vector<8x16xf32>
    %38 = tpu.concatenate %34, %35, %36, %37 in 0 : vector<8x16xf32>, vector<8x16xf32>, vector<8x16xf32>, vector<8x16xf32> -> vector<32x16xf32>
    %39 = vector.extract_strided_slice %28 {offsets = [0, 0], sizes = [8, 16], strides = [1, 1]} : vector<16x32xf32> to vector<8x16xf32>
    %40 = vector.extract_strided_slice %28 {offsets = [0, 16], sizes = [8, 16], strides = [1, 1]} : vector<16x32xf32> to vector<8x16xf32>
    %41 = vector.extract_strided_slice %28 {offsets = [8, 0], sizes = [8, 16], strides = [1, 1]} : vector<16x32xf32> to vector<8x16xf32>
    %42 = vector.extract_strided_slice %28 {offsets = [8, 16], sizes = [8, 16], strides = [1, 1]} : vector<16x32xf32> to vector<8x16xf32>
    %43 = tpu.concatenate %39, %40, %41, %42 in 0 : vector<8x16xf32>, vector<8x16xf32>, vector<8x16xf32>, vector<8x16xf32> -> vector<32x16xf32>
    %cst_22 = arith.constant dense<0.000000e+00> : vector<32x32xf32>
    %44 = tpu.matmul %33, %38, %cst_22 {dimension_numbers = #tpu.dot_dimension_numbers<[1], [1], [0], [0], [0, 0, 1, 0], [], []>} : vector<32x16xf32>, vector<32x16xf32>, vector<32x32xf32> -> vector<32x32xf32>
    %45 = arith.addf %44, %6 : vector<32x32xf32>
    %cst_23 = arith.constant dense<0xFF800000> : vector<32xf32>
    %46 = vector.multi_reduction <maximumf>, %45, %cst_23 [1] : vector<32x32xf32> to vector<32xf32>
    %47 = vector.shape_cast %46 : vector<32xf32> to vector<32x1xf32>
    %48 = vector.broadcast %47 : vector<32x1xf32> to vector<32x32xf32>
    %49 = arith.subf %45, %48 : vector<32x32xf32>
    %50 = math.exp %49 : vector<32x32xf32>
    %cst_24 = arith.constant dense<0.000000e+00> : vector<32xf32>
    %51 = vector.multi_reduction <add>, %50, %cst_24 [1] : vector<32x32xf32> to vector<32xf32>
    %52 = vector.shape_cast %51 : vector<32xf32> to vector<32x1xf32>
    %53 = tpu.reciprocal %52 {approx = true} : vector<32x1xf32> -> vector<32x1xf32>
    %54 = vector.broadcast %53 : vector<32x1xf32> to vector<32x32xf32>
    %55 = arith.mulf %50, %54 : vector<32x32xf32>
    %cst_25 = arith.constant dense<0.000000e+00> : vector<32x16xf32>
    %56 = tpu.matmul %55, %43, %cst_25 {dimension_numbers = #tpu.dot_dimension_numbers<[1], [0], [0], [1], [0, 0, 1, 1], [], []>} : vector<32x32xf32>, vector<32x16xf32>, vector<32x16xf32> -> vector<32x16xf32>
    %57 = vector.extract_strided_slice %56 {offsets = [0, 0], sizes = [8, 16], strides = [1, 1]} : vector<32x16xf32> to vector<8x16xf32>
    %58 = vector.extract_strided_slice %56 {offsets = [8, 0], sizes = [8, 16], strides = [1, 1]} : vector<32x16xf32> to vector<8x16xf32>
    %59 = tpu.concatenate %57, %58 in 1 : vector<8x16xf32>, vector<8x16xf32> -> vector<8x32xf32>
    %60 = vector.extract_strided_slice %56 {offsets = [16, 0], sizes = [8, 16], strides = [1, 1]} : vector<32x16xf32> to vector<8x16xf32>
    %61 = vector.extract_strided_slice %56 {offsets = [24, 0], sizes = [8, 16], strides = [1, 1]} : vector<32x16xf32> to vector<8x16xf32>
    %62 = tpu.concatenate %60, %61 in 1 : vector<8x16xf32>, vector<8x16xf32> -> vector<8x32xf32>
    %63 = tpu.concatenate %59, %62 in 0 : vector<8x32xf32>, vector<8x32xf32> -> vector<16x32xf32>
    %cst_26 = arith.constant dense<0.000000e+00> : vector<16x32xf32>
    %64 = tpu.matmul %63, %3, %cst_26 {dimension_numbers = #tpu.dot_dimension_numbers<[1], [0], [0], [1], [0, 0, 1, 1], [], []>} : vector<16x32xf32>, vector<32x32xf32>, vector<16x32xf32> -> vector<16x32xf32>
    %65 = vector.broadcast %10 : vector<1x32xf32> to vector<16x32xf32>
    %66 = arith.addf %64, %65 : vector<16x32xf32>
    %67 = arith.addf %22, %66 : vector<16x32xf32>
    %cst_27 = arith.constant dense<0.000000e+00> : vector<16xf32>
    %68 = vector.multi_reduction <add>, %67, %cst_27 [1] : vector<16x32xf32> to vector<16xf32>
    %69 = vector.shape_cast %68 : vector<16xf32> to vector<16x1xf32>
    %cst_28 = arith.constant 3.200000e+01 : f32
    %70 = vector.broadcast %cst_28 : f32 to vector<16x1xf32>
    %71 = arith.divf %69, %70 : vector<16x1xf32>
    %72 = vector.broadcast %71 : vector<16x1xf32> to vector<16x32xf32>
    %73 = arith.subf %67, %72 : vector<16x32xf32>
    %74 = arith.mulf %73, %73 : vector<16x32xf32>
    %cst_29 = arith.constant dense<0.000000e+00> : vector<16xf32>
    %75 = vector.multi_reduction <add>, %74, %cst_29 [1] : vector<16x32xf32> to vector<16xf32>
    %76 = vector.shape_cast %75 : vector<16xf32> to vector<16x1xf32>
    %cst_30 = arith.constant 3.200000e+01 : f32
    %77 = vector.broadcast %cst_30 : f32 to vector<16x1xf32>
    %78 = arith.divf %76, %77 : vector<16x1xf32>
    %79 = vector.broadcast %71 : vector<16x1xf32> to vector<16x32xf32>
    %80 = arith.subf %67, %79 : vector<16x32xf32>
    %cst_31 = arith.constant 9.99999974E-6 : f32
    %81 = vector.broadcast %cst_31 : f32 to vector<16x1xf32>
    %82 = arith.addf %78, %81 : vector<16x1xf32>
    %83 = math.rsqrt %82 : vector<16x1xf32>
    %84 = vector.broadcast %83 : vector<16x1xf32> to vector<16x32xf32>
    %85 = arith.mulf %80, %84 : vector<16x32xf32>
    %86 = vector.broadcast %11 : vector<1x32xf32> to vector<16x32xf32>
    %87 = arith.mulf %85, %86 : vector<16x32xf32>
    %88 = vector.broadcast %12 : vector<1x32xf32> to vector<16x32xf32>
    %89 = arith.addf %87, %88 : vector<16x32xf32>
    %cst_32 = arith.constant dense<0.000000e+00> : vector<16x64xf32>
    %90 = tpu.matmul %89, %4, %cst_32 {dimension_numbers = #tpu.dot_dimension_numbers<[1], [0], [0], [1], [0, 0, 1, 1], [], []>} : vector<16x32xf32>, vector<32x64xf32>, vector<16x64xf32> -> vector<16x64xf32>
    %91 = vector.broadcast %13 : vector<1x64xf32> to vector<16x64xf32>
    %92 = arith.addf %90, %91 : vector<16x64xf32>
    %cst_33 = arith.constant 0.000000e+00 : f32
    %93 = vector.broadcast %cst_33 : f32 to vector<16x64xf32>
    %94 = arith.maximumf %92, %93 : vector<16x64xf32>
    %cst_34 = arith.constant dense<0.000000e+00> : vector<16x32xf32>
    %95 = tpu.matmul %94, %5, %cst_34 {dimension_numbers = #tpu.dot_dimension_numbers<[1], [0], [0], [1], [0, 0, 1, 1], [], []>} : vector<16x64xf32>, vector<64x32xf32>, vector<16x32xf32> -> vector<16x32xf32>
    %96 = vector.broadcast %14 : vector<1x32xf32> to vector<16x32xf32>
    %97 = arith.addf %95, %96 : vector<16x32xf32>
    %98 = arith.addf %89, %97 : vector<16x32xf32>
    %cst_35 = arith.constant dense<0.000000e+00> : vector<16xf32>
    %99 = vector.multi_reduction <add>, %98, %cst_35 [1] : vector<16x32xf32> to vector<16xf32>
    %100 = vector.shape_cast %99 : vector<16xf32> to vector<16x1xf32>
    %cst_36 = arith.constant 3.200000e+01 : f32
    %101 = vector.broadcast %cst_36 : f32 to vector<16x1xf32>
    %102 = arith.divf %100, %101 : vector<16x1xf32>
    %103 = vector.broadcast %102 : vector<16x1xf32> to vector<16x32xf32>
    %104 = arith.subf %98, %103 : vector<16x32xf32>
    %105 = arith.mulf %104, %104 : vector<16x32xf32>
    %cst_37 = arith.constant dense<0.000000e+00> : vector<16xf32>
    %106 = vector.multi_reduction <add>, %105, %cst_37 [1] : vector<16x32xf32> to vector<16xf32>
    %107 = vector.shape_cast %106 : vector<16xf32> to vector<16x1xf32>
    %cst_38 = arith.constant 3.200000e+01 : f32
    %108 = vector.broadcast %cst_38 : f32 to vector<16x1xf32>
    %109 = arith.divf %107, %108 : vector<16x1xf32>
    %110 = vector.broadcast %102 : vector<16x1xf32> to vector<16x32xf32>
    %111 = arith.subf %98, %110 : vector<16x32xf32>
    %cst_39 = arith.constant 9.99999974E-6 : f32
    %112 = vector.broadcast %cst_39 : f32 to vector<16x1xf32>
    %113 = arith.addf %109, %112 : vector<16x1xf32>
    %114 = math.rsqrt %113 : vector<16x1xf32>
    %115 = vector.broadcast %114 : vector<16x1xf32> to vector<16x32xf32>
    %116 = arith.mulf %111, %115 : vector<16x32xf32>
    %117 = vector.broadcast %15 : vector<1x32xf32> to vector<16x32xf32>
    %118 = arith.mulf %116, %117 : vector<16x32xf32>
    %119 = vector.broadcast %16 : vector<1x32xf32> to vector<16x32xf32>
    %120 = arith.addf %118, %119 : vector<16x32xf32>
    %cst_40 = arith.constant dense<0.000000e+00> : vector<16xf32>
    %121 = vector.multi_reduction <add>, %120, %cst_40 [1] : vector<16x32xf32> to vector<16xf32>
    %122 = vector.shape_cast %121 : vector<16xf32> to vector<16x1xf32>
    %cst_41 = arith.constant 3.200000e+01 : f32
    %123 = vector.broadcast %cst_41 : f32 to vector<16x1xf32>
    %124 = arith.divf %122, %123 : vector<16x1xf32>
    %125 = vector.broadcast %124 : vector<16x1xf32> to vector<16x32xf32>
    %126 = arith.subf %120, %125 : vector<16x32xf32>
    %127 = arith.mulf %126, %126 : vector<16x32xf32>
    %cst_42 = arith.constant dense<0.000000e+00> : vector<16xf32>
    %128 = vector.multi_reduction <add>, %127, %cst_42 [1] : vector<16x32xf32> to vector<16xf32>
    %129 = vector.shape_cast %128 : vector<16xf32> to vector<16x1xf32>
    %cst_43 = arith.constant 3.200000e+01 : f32
    %130 = vector.broadcast %cst_43 : f32 to vector<16x1xf32>
    %131 = arith.divf %129, %130 : vector<16x1xf32>
    %132 = vector.broadcast %124 : vector<16x1xf32> to vector<16x32xf32>
    %133 = arith.subf %120, %132 : vector<16x32xf32>
    %cst_44 = arith.constant 9.99999974E-6 : f32
    %134 = vector.broadcast %cst_44 : f32 to vector<16x1xf32>
    %135 = arith.addf %131, %134 : vector<16x1xf32>
    %136 = math.rsqrt %135 : vector<16x1xf32>
    %137 = vector.broadcast %136 : vector<16x1xf32> to vector<16x32xf32>
    %138 = arith.mulf %133, %137 : vector<16x32xf32>
    %139 = vector.broadcast %17 : vector<1x32xf32> to vector<16x32xf32>
    %140 = arith.mulf %138, %139 : vector<16x32xf32>
    %141 = vector.broadcast %18 : vector<1x32xf32> to vector<16x32xf32>
    %142 = arith.addf %140, %141 : vector<16x32xf32>
    %c0_45 = arith.constant 0 : index
    %c0_46 = arith.constant 0 : index
    %143 = vector.load %arg3[%c0_45, %c0_46] : memref<16x32xf32, #tpu.memory_space<vmem>>, vector<16x32xf32>
    tpu.vector_store %arg3[%c0_45, %c0_46], %142 {strides = array<i32>} : memref<16x32xf32, #tpu.memory_space<vmem>>, vector<16x32xf32>,
    return
  }
}

</mosaic_0001>

<bundles_post_ra>
// kernel: tpu_custom_call.1
= control target key start
LH: loop header
LB: loop body
LE: loop exit
PB: predicated region body
PF: predicated region fallthrough
CT: control target
= control target key end

     0   :  { %8 = vsyncpa [#allocation3], 0  ;;  %s1485_s0 = inlined_call_operand.hbm [shape: f32[16,16], index: 0, kind: input, shape index: {}]   ;;  %s1486_s1 = inlined_call_operand.hbm [shape: f32[224,128], index: 1, kind: input, shape index: {}]   ;;  %s1487_s2 = inlined_call_operand.hbm [shape: f32[16,128], index: 2, kind: input, shape index: {}]   ;;  %s1488_s3 = inlined_call_operand.hbm [shape: f32[16,32], index: 3, kind: output, shape index: {}]  }
   0x1   :  { %9 = vsyncpa [#allocation6], 0 }
   0x2   :  { %10 = vsyncpa [#allocation4], 0  ;;  %s1330_s12 = smov [#allocation5]   ;;  %s1331_s14 = smov [#allocation2]  }
   0x3   :  { %s28_s13 = sshll.u32 %s1330_s12, 4  ;;  %s16_s15 = sshll.u32 %s1331_s14, 4  ;;  %s29_s13 = int_to_ptr.vmem [resolvable:$true] %s28_s13  ;;  %s1360_s15 = int_to_ptr.vmem [resolvable:$true] %s16_s15 }
   0x4   :  { %s1236_s18 = scalar_lea.hbm %s1486_s1, 3584 }
   0x5   :  { %p1237_p0 = scmp.ne.s32.totalorder %s1486_s1, %s1236_s18  ;;  %p1240_p1 = scmp.lt.u32.totalorder %s1236_s18, %s1486_s1 }
   0x7   :  { %p1242_p2 = pnand %p1240_p1, %p1237_p0 }
   0x9   :  { %1245 = shalt.err (!%p1242_p2)
}
   0xa   :  { %s1246_s23 = scalar_lea.vmem %s29_s13, 3584  ;;  %p1251_p4 = scmp.lt.s32.totalorder %s29_s13, %s29_s13 }
   0xb   :  { %p1247_p3 = scmp.ne.s32.totalorder %s29_s13, %s1246_s23  ;;  %p1252_p5 = scmp.lt.s32.totalorder %s1246_s23, %s1246_s23 }
   0xd   :  { %p1253_p6 = por %p1252_p5, %p1251_p4 }
   0xf   :  { %p1254_p7 = pnand %p1253_p6, %p1247_p3 }
  0x11   :  { %1257 = shalt.err (!%p1254_p7)
}
  0x12   :  { %s1332_s24 = smov 128   ;;  %s1333_s25 = smov 8  }
  0x13   :  { %34 = dma.hbm_to_vmem [thread:$0]  %s1486_s1, 3584, %s29_s13, [#allocation6], %s1332_s24, %s1332_s24, %s1333_s25  }
  0x14   :  { %s1258_s30 = scalar_lea.hbm %s1485_s0, 256 }
  0x15   :  { %p1259_p8 = scmp.ne.s32.totalorder %s1485_s0, %s1258_s30  ;;  %p1262_p9 = scmp.lt.u32.totalorder %s1258_s30, %s1485_s0 }
  0x17   :  { %p1264_p10 = pnand %p1262_p9, %p1259_p8 }
  0x19   :  { %1267 = shalt.err (!%p1264_p10)
}
  0x1a   :  { %s1268_s8 = scalar_lea.vmem %s1360_s15, 256  ;;  %p1273_p12 = scmp.lt.s32.totalorder %s1360_s15, %s1360_s15 }
  0x1b   :  { %p1269_p11 = scmp.ne.s32.totalorder %s1360_s15, %s1268_s8  ;;  %p1274_p13 = scmp.lt.s32.totalorder %s1268_s8, %s1268_s8 }
  0x1d   :  { %p1275_p0 = por %p1274_p13, %p1273_p12 }
  0x1f   :  { %p1276_p1 = pnand %p1275_p0, %p1269_p11 }
  0x21   :  { %1279 = shalt.err (!%p1276_p1)
}
  0x22   :  { %22 = dma.hbm_to_vmem [thread:$0]  %s1485_s0, 256, %s1360_s15, [#allocation3], %s1332_s24, %s1332_s24, %s1333_s25  }
  0x23   :  { %s1334_s10 = smov [#allocation7]   ;;  %s1280_s14 = scalar_lea.hbm %s1487_s2, 256 }
  0x24   :  { %s40_s11 = sshll.u32 %s1334_s10, 4  ;;  %p1281_p2 = scmp.ne.s32.totalorder %s1487_s2, %s1280_s14  ;;  %s41_s11 = int_to_ptr.vmem [resolvable:$true] %s40_s11 }
  0x25   :  { %p1284_p3 = scmp.lt.u32.totalorder %s1280_s14, %s1487_s2 }
  0x27   :  { %p1286_p4 = pnand %p1284_p3, %p1281_p2 }
  0x29   :  { %1289 = shalt.err (!%p1286_p4)
}
  0x2a   :  { %s1290_s20 = scalar_lea.vmem %s41_s11, 256  ;;  %p1295_p6 = scmp.lt.s32.totalorder %s41_s11, %s41_s11 }
  0x2b   :  { %p1291_p5 = scmp.ne.s32.totalorder %s41_s11, %s1290_s20  ;;  %p1296_p7 = scmp.lt.s32.totalorder %s1290_s20, %s1290_s20 }
  0x2d   :  { %p1297_p8 = por %p1296_p7, %p1295_p6 }
  0x2f   :  { %p1298_p9 = pnand %p1297_p8, %p1291_p5 }
  0x31   :  { %1301 = shalt.err (!%p1298_p9)
}
  0x32   :  { %46 = dma.hbm_to_vmem [thread:$0]  %s1487_s2, 256, %s41_s11, [#allocation6], %s1332_s24, %s1332_s24, %s1333_s25  }
  0x33   :  { %1324 = dma.done.wait [#allocation3], 256  }
  0x34   :  { %1325 = vsyncadd [#allocation3], 4294967040 }
  0x35   :  { %1326 = dma.done.wait [#allocation6], 3840  }
  0x36   :  { %1327 = vsyncadd [#allocation6], 4294963456  ;;  %vm101_vm0 = vcmask 130048   ;;  %v58_v0 = vld [vmem:[#allocation5] sm:$0xff]  ;;  %v59_v1 = vld [vmem:[#allocation5 + $0x8] sm:$0xff]  ;;  %vm189_vm1 = vcmask 261120  }
  0x37   :  { %v56_v2 = vld [vmem:[#allocation2] sm:$0xff]  ;;  %v1114_v3 = vpack.c.bf16 %v59_v1, %v58_v0  ;;  %v61_v5 = vld [vmem:[#allocation5 + $0x18] sm:$0xff]  ;;  %v62_v8 = vld [vmem:[#allocation5 + $0x20] sm:$0xff]  ;;  %s1335_s2 = smov 112   ;;  %s1336_s21 = smov 96   ;;  %vm766_vm3 = vcmask 523264  }
  0x38   :  { %1031 = vmatprep.mubr.msk.f32.mxu0 %vm101_vm0, %v56_v2  ;;  %v60_v4 = vld [vmem:[#allocation5 + $0x10] sm:$0xff]  ;;  %v57_v7 = vld [vmem:[#allocation2 + $0x8] sm:$0xff]  ;;  %v63_v9 = vld [vmem:[#allocation5 + $0x28] sm:$0xff]  ;;  %s1337_s22 = smov 64   ;;  %s1338_s23 = smov 16  }
  0x39   :  { %v1118_v6 = vpack.c.bf16 %v61_v5, %v60_v4  ;;  %1115 = vmatprep.subr.bf16.mxu0 %v1114_v3  ;;  %v1122_v10 = vpack.c.bf16 %v63_v9, %v62_v8  ;;  %v946_v11 = vld [vmem:[#allocation7] ss:$0 sm:$0xff]  ;;  %v84_v14 = vld [vmem:[#allocation5 + $0xd0] sm:$0xff]  ;;  %v85_v16 = vld [vmem:[#allocation5 + $0xd8] sm:$0xff]  ;;  %s1339_s26 = smov [#allocation8]  }
  0x3a   :  { %1117 = vmatpush3.bf16.msra.mxu0 %v1114_v3  ;;  %v949_v20 = vld [vmem:[#allocation7 + $0x1] ss:$0 sm:$0xff]  ;;  %vm1127_vm2 = vmpackc.low %vm101_vm0, %vm101_vm0  ;;  %v81_v37 = vld [vmem:[#allocation5 + $0xb8] sm:$0xff]  ;;  %s933_s27 = sshll.u32 %s1339_s26, 4  ;;  %s934_s27 = int_to_ptr.vmem [resolvable:$true] %s933_s27 }
  0x3b   :  { %1119 = vmatprep.subr.bf16.mxu0 %v1118_v6  ;;  %v80_v38 = vld [vmem:[#allocation5 + $0xb0] sm:$0xff]  ;;  %v82_v44 = vld [vmem:[#allocation5 + $0xc0] sm:$0xff]  ;;  %v83_v47 = vld [vmem:[#allocation5 + $0xc8] sm:$0xff]  ;;  %s1302_s28 = scalar_lea.vmem %s934_s27, 256  ;;  %p1307_p11 = scmp.lt.s32.totalorder %s934_s27, %s934_s27 }
  0x3c   :  { %p1303_p10 = scmp.ne.s32.totalorder %s934_s27, %s1302_s28  ;;  %p1308_p12 = scmp.lt.s32.totalorder %s1302_s28, %s1302_s28 }
  0x3d   :  { %1032 = vmatmul.mubr.msk.f32.vlgmr.msra.gmra.mrb[0].mxu0 %vm101_vm0, %v57_v7 }
  0x3e   :  { %1121 = vmatpush3.bf16.msra.mxu0 %v1118_v6  ;;  %p1309_p13 = por %p1308_p12, %p1307_p11 }
  0x3f   :  { %1123 = vmatprep.subr.bf16.mxu0 %v1122_v10 }
  0x40   :  { %p1310_p0 = pnand %p1309_p13, %p1303_p10 }
  0x42   :  { %1125 = vmatpush3.bf16.msra.mxu0 %v1122_v10 }
 0x110   :  { %v1033_v12 = vpop.f32.mrb[0].mxu0 }
 0x111   :  { %v180_v13 = vadd.f32 %v1033_v12, %v946_v11  ;;  %v174_v15 = vpop.f32.mrb[1].mxu0 }
 0x112   :  { %v175_v17 = vadd.f32 %v946_v11, %v174_v15 }
 0x113   :  { %v1416_v19 = vadd.f32 %v180_v13, %v85_v16 }
 0x114   :  { %v1414_v18 = vadd.f32 %v175_v17, %v84_v14 }
 0x116   :  { %1042 = vmatprep.mubr.msk.f32.mxu0 %vm189_vm1, %v1414_v18 }
 0x117   :  { %1043 = vmatmul.mubr.msk.f32.vlgmr.msra.gmra.mrb[2].mxu0 %vm189_vm1, %v1416_v19 }
 0x1ea   :  { %v1044_v21 = vpop.f32.mrb[2].mxu0 }
 0x1eb   :  { %v262_v22 = vpop.f32.mrb[3].mxu0  ;;  %v268_v24 = vadd.f32 %v1044_v21, %v949_v20 }
 0x1ec   :  { %v263_v23 = vadd.f32 %v949_v20, %v262_v22 }
 0x1ee   :  { %272 = vrot.lane.b32.xlu0 %v263_v23, %s1335_s2  ;;  %1053 = vmatprep.mubr.msk.f32.mxu0 %vm101_vm0, %v263_v23 }
 0x1f2   :  { %275 = vrot.lane.b32.xlu0 %v268_v24, %s1335_s2 }
 0x260   :  { %v273_v25 = vpop.permute.xlu0 %272 }
 0x261   :  { %v1423_v26 = vpack.i.bf16 %v273_v25, %v263_v23 }
 0x263   :  { %1189 = vrot.lane.b32.xlu1 %v1423_v26, %s1336_s21 }
 0x264   :  { %v276_v27 = vpop.permute.xlu0 %275 }
 0x265   :  { %v1426_v28 = vpack.i.bf16 %v276_v27, %v268_v24 }
 0x267   :  { %1194 = vrot.lane.b32.xlu1 %v1426_v28, %s1336_s21 }
 0x2d5   :  { %v1190_v29 = vpop.permute.xlu1 %1189 }
 0x2d6   :  { %v1192_v30 = vunpack.i.h.bf16 %v1190_v29  ;;  %v1191_v31 = vunpack.i.l.bf16 %v1190_v29 }
 0x2d8   :  { %v1126_v32 = vpack.c.bf16 %v1192_v30, %v1191_v31  ;;  %v64_v31 = vld [vmem:[#allocation5 + $0x30] sm:$0xff] }
 0x2d9   :  { %v1195_v33 = vpop.permute.xlu1 %1194 }
 0x2da   :  { %v1197_v34 = vunpack.i.h.bf16 %v1195_v33  ;;  %v1196_v35 = vunpack.i.l.bf16 %v1195_v33  ;;  %1128 = vmatprep.subr.msk.bf16.mxu0 %vm1127_vm2, %v1126_v32 }
 0x2db   :  { %1131 = vmatpush3.bf16.xpose.msk.msra.mxu0 %vm1127_vm2, %v1126_v32  ;;  %v65_v32 = vld [vmem:[#allocation5 + $0x38] sm:$0xff] }
 0x2dc   :  { %v1132_v36 = vpack.c.bf16 %v1197_v34, %v1196_v35  ;;  %v1146_v33 = vpack.c.bf16 %v65_v32, %v64_v31  ;;  %v66_v34 = vld [vmem:[#allocation5 + $0x40] sm:$0xff]  ;;  %v67_v35 = vld [vmem:[#allocation5 + $0x48] sm:$0xff] }
 0x2dd   :  { %v78_v31 = vld [vmem:[#allocation5 + $0xa0] sm:$0xff]  ;;  %v79_v32 = vld [vmem:[#allocation5 + $0xa8] sm:$0xff] }
 0x2de   :  { %1134 = vmatprep.subr.msk.bf16.mxu0 %vm1127_vm2, %v1132_v36 }
 0x2e3   :  { %1137 = vmatpush3.bf16.xpose.msk.msra.mxu0 %vm1127_vm2, %v1132_v36  ;;  %v1150_v36 = vpack.c.bf16 %v67_v35, %v66_v34  ;;  %v969_v34 = vld [vmem:[#allocation7 + $0x5] ss:$0 sm:$0xff] }
 0x2ea   :  { %1054 = vmatmul.mubr.msk.f32.vlgmr.msra.gmra.mrb[4].mxu0 %vm101_vm0, %v273_v25 }
 0x2eb   :  { %1056 = vmatprep.mubr.msk.f32.mxu0 %vm101_vm0, %v268_v24 }
 0x2ee   :  { %1057 = vmatmul.mubr.msk.f32.gmra.mrb[6].mxu0 %vm101_vm0, %v276_v27 }
 0x3bd   :  { %v1055_v39 = vpop.f32.mrb[4].mxu0 }
 0x3be   :  { %v373_v40 = vadd.f32 %v1055_v39, %v81_v37  ;;  %v367_v41 = vpop.f32.mrb[5].mxu0 }
 0x3bf   :  { %v368_v42 = vadd.f32 %v367_v41, %v80_v38 }
 0x3c0   :  { %v389_v43 = vsel %vm189_vm1, %v373_v40, -inf }
 0x3c1   :  { %390 = vmax.xlane.f32.xlu1 %v389_v43  ;;  %v1058_v45 = vpop.f32.mrb[6].mxu0  ;;  %v386_v46 = vsel %vm189_vm1, %v368_v42, -inf }
 0x3c2   :  { %v377_v48 = vpop.f32.mrb[7].mxu0  ;;  %387 = vmax.xlane.f32.xlu0 %v386_v46  ;;  %v383_v50 = vadd.f32 %v1058_v45, %v83_v47  ;;  %v964_v45 = vld [vmem:[#allocation7 + $0x2] ss:$0 sm:$0xff] }
 0x3c3   :  { %v378_v49 = vadd.f32 %v377_v48, %v82_v44 }
 0x3c4   :  { %v395_v52 = vsel %vm189_vm1, %v383_v50, -inf }
 0x3c5   :  { %v392_v51 = vsel %vm189_vm1, %v378_v49, -inf }
 0x3c6   :  { %393 = vmax.xlane.f32.xlu0 %v392_v51 }
 0x3ca   :  { %396 = vmax.xlane.f32.xlu0 %v395_v52 }
 0x44e   :  { %v391_v53 = vpop.xlane.xlu1 %390 }
 0x44f   :  { %v399_v54 = vsub.f32 %v373_v40, %v391_v53  ;;  %v388_v55 = vpop.xlane.xlu0 %387 }
 0x450   :  { %v398_v56 = vsub.f32 %v368_v42, %v388_v55 }
 0x451   :  { %v404_v57 = vmul.f32 1.442695, %v399_v54 }
 0x452   :  { %v402_v58 = vmul.f32 1.442695, %v398_v56 }
 0x453   :  { %1208 = vpow2.f32 %v404_v57  ;;  %v394_v59 = vpop.xlane.xlu0 %393 }
 0x454   :  { %1210 = vpow2.f32 %v402_v58  ;;  %v400_v60 = vsub.f32 %v378_v49, %v394_v59 }
 0x456   :  { %v406_v61 = vmul.f32 1.442695, %v400_v60 }
 0x457   :  { %v397_v62 = vpop.xlane.xlu0 %396 }
 0x458   :  { %1212 = vpow2.f32 %v406_v61  ;;  %v401_v63 = vsub.f32 %v383_v50, %v397_v62 }
 0x45a   :  { %v408_v0 = vmul.f32 1.442695, %v401_v63  ;;  %v69_v63 = vld [vmem:[#allocation5 + $0x58] sm:$0xff] }
 0x45c   :  { %1214 = vpow2.f32 %v408_v0 }
 0x45d   :  { %v1209_v1 = vpop.eup %1208 }
 0x45e   :  { %v1211_v2 = vpop.eup %1210  ;;  %v413_v3 = vsel %vm189_vm1, %v1209_v1, 0.0 }
 0x45f   :  { %414 = vadd.xlane.f32.xlu0 %v413_v3  ;;  %v410_v4 = vsel %vm189_vm1, %v1211_v2, 0.0 }
 0x460   :  { %411 = vadd.xlane.f32.xlu1 %v410_v4  ;;  %v72_v4 = vld [vmem:[#allocation5 + $0x70] sm:$0xff] }
 0x462   :  { %v1213_v5 = vpop.eup %1212 }
 0x463   :  { %v416_v6 = vsel %vm189_vm1, %v1213_v5, 0.0 }
 0x464   :  { %417 = vadd.xlane.f32.xlu1 %v416_v6  ;;  %v74_v6 = vld [vmem:[#allocation5 + $0x80] sm:$0xff] }
 0x466   :  { %v1215_v7 = vpop.eup %1214 }
 0x467   :  { %v419_v8 = vsel %vm189_vm1, %v1215_v7, 0.0 }
 0x468   :  { %420 = vadd.xlane.f32.xlu0 %v419_v8  ;;  %v75_v8 = vld [vmem:[#allocation5 + $0x88] sm:$0xff] }
 0x475   :  { %1199 = vrot.lane.b32.xlu1 %v1423_v26, %s1337_s22 }
 0x47e   :  { %1204 = vrot.lane.b32.xlu0 %v1426_v28, %s1337_s22 }
 0x4ec   :  { %v415_v10 = vpop.xlane.xlu0 %414 }
 0x4ed   :  { %v412_v9 = vpop.xlane.xlu1 %411 }
 0x4ee   :  { %1216 = vrcp.f32 %v412_v9  ;;  %v1166_v9 = vpack.c.bf16 %v75_v8, %v74_v6 }
 0x4ef   :  { %1218 = vrcp.f32 %v415_v10  ;;  %v76_v10 = vld [vmem:[#allocation5 + $0x90] sm:$0xff] }
 0x4f1   :  { %v418_v11 = vpop.xlane.xlu1 %417 }
 0x4f2   :  { %1220 = vrcp.f32 %v418_v11  ;;  %v77_v11 = vld [vmem:[#allocation5 + $0x98] sm:$0xff] }
 0x4f5   :  { %v1200_v12 = vpop.permute.xlu1 %1199  ;;  %v421_v13 = vpop.xlane.xlu0 %420 }
 0x4f6   :  { %v1202_v14 = vunpack.i.h.bf16 %v1200_v12  ;;  %v1201_v15 = vunpack.i.l.bf16 %v1200_v12  ;;  %1222 = vrcp.f32 %v421_v13  ;;  %v1170_v12 = vpack.c.bf16 %v77_v11, %v76_v10 }
 0x4f8   :  { %v1217_v16 = vpop.eup %1216  ;;  %v1138_v17 = vpack.c.bf16 %v1202_v14, %v1201_v15 }
 0x4f9   :  { %v1205_v20 = vpop.permute.xlu0 %1204  ;;  %v426_v21 = vmul.f32 %v1217_v16, %v1211_v2  ;;  %v1219_v25 = vpop.eup %1218  ;;  %v71_v2 = vld [vmem:[#allocation5 + $0x68] sm:$0xff] }
 0x4fa   :  { %v1207_v22 = vunpack.i.h.bf16 %v1205_v20  ;;  %v1206_v23 = vunpack.i.l.bf16 %v1205_v20  ;;  %1139 = vmatprep.subr.bf16.mxu1 %v1138_v17  ;;  %v427_v27 = vmul.f32 %v1219_v25, %v1209_v1  ;;  %v70_v1 = vld [vmem:[#allocation5 + $0x60] sm:$0xff] }
 0x4fb   :  { %1141 = vmatpush3.bf16.msra.mxu1 %v1138_v17  ;;  %1067 = vmatprep.mubr.msk.f32.mxu1 %vm189_vm1, %v426_v21  ;;  %v1158_v3 = vpack.c.bf16 %v71_v2, %v70_v1  ;;  %v975_v1 = vld [vmem:[#allocation7 + $0x7] ss:$0 sm:$0xff] }
 0x4fc   :  { %v1142_v24 = vpack.c.bf16 %v1207_v22, %v1206_v23  ;;  %v1221_v26 = vpop.eup %1220  ;;  %v967_v22 = vld [vmem:[#allocation7 + $0x3] ss:$0 sm:$0xff] }
 0x4fd   :  { %v428_v29 = vmul.f32 %v1221_v26, %v1213_v5  ;;  %v73_v5 = vld [vmem:[#allocation5 + $0x78] sm:$0xff] }
 0x4fe   :  { %1143 = vmatprep.subr.bf16.mxu1 %v1142_v24 }
 0x4ff   :  { %1145 = vmatpush3.bf16.msra.mxu1 %v1142_v24  ;;  %v968_v24 = vld [vmem:[#allocation7 + $0x4] ss:$0 sm:$0xff] }
 0x500   :  { %v1223_v28 = vpop.eup %1222  ;;  %1147 = vmatprep.subr.bf16.mxu1 %v1146_v33 }
 0x501   :  { %v429_v30 = vmul.f32 %v1223_v28, %v1215_v7  ;;  %v1162_v7 = vpack.c.bf16 %v73_v5, %v72_v4  ;;  %v976_v4 = vld [vmem:[#allocation7 + $0x8] ss:$0 sm:$0xff] }
 0x502   :  { %1068 = vmatmul.mubr.msk.f32.vlgmr.msra.gmra.mrb[0].mxu1 %vm189_vm1, %v427_v27 }
 0x503   :  { %1070 = vmatprep.mubr.msk.f32.mxu1 %vm189_vm1, %v428_v29  ;;  %1149 = vmatpush3.bf16.msra.mxu1 %v1146_v33  ;;  %v1174_v33 = vpack.c.bf16 %v79_v32, %v78_v31  ;;  %v977_v31 = vld [vmem:[#allocation7 + $0x9] ss:$0 sm:$0xff] }
 0x504   :  { %1151 = vmatprep.subr.bf16.mxu1 %v1150_v36 }
 0x506   :  { %1071 = vmatmul.mubr.msk.f32.gmra.mrb[2].mxu1 %vm189_vm1, %v429_v30 }
 0x507   :  { %1153 = vmatpush3.bf16.msra.mxu1 %v1150_v36 }
 0x508   :  { %1163 = vmatprep.subr.bf16.mxu1 %v1162_v7 }
 0x5d5   :  { %v1069_v37 = vpop.f32.mrb[0].mxu1 }
 0x5d6   :  { %540 = vrot.lane.b32.xlu1 %v1069_v37, %s1338_s23  ;;  %v520_v38 = vpop.f32.mrb[1].mxu1 }
 0x5d9   :  { %v1072_v39 = vpop.f32.mrb[2].mxu1 }
 0x5da   :  { %545 = vrot.lane.b32.xlu1 %v1072_v39, %s1338_s23  ;;  %v530_v40 = vpop.f32.mrb[3].mxu1 }
 0x648   :  { %v541_v41 = vpop.permute.xlu1 %540 }
 0x649   :  { %v543_v42 = vsel %vm101_vm0, %v520_v38, %v541_v41  ;;  %v972_v41 = vld [vmem:[#allocation7 + $0x6] ss:$0 sm:$0xff] }
 0x64a   :  { %1081 = vmatprep.mubr.msk.f32.mxu1 %vm189_vm1, %v543_v42 }
 0x64c   :  { %v546_v43 = vpop.permute.xlu1 %545 }
 0x64d   :  { %v548_v44 = vsel %vm101_vm0, %v530_v40, %v546_v43 }
 0x64e   :  { %1082 = vmatmul.mubr.msk.f32.vlgmr.msra.gmra.mrb[4].mxu1 %vm189_vm1, %v548_v44 }
 0x64f   :  { %1165 = vmatpush3.bf16.msra.mxu1 %v1162_v7 }
 0x650   :  { %1167 = vmatprep.subr.bf16.mxu1 %v1166_v9 }
 0x653   :  { %1169 = vmatpush3.bf16.msra.mxu1 %v1166_v9 }
 0x654   :  { %1171 = vmatprep.subr.bf16.mxu1 %v1170_v12 }
 0x657   :  { %1173 = vmatpush3.bf16.msra.mxu1 %v1170_v12 }
 0x658   :  { %1175 = vmatprep.subr.bf16.mxu1 %v1174_v33 }
 0x65b   :  { %1177 = vmatpush3.bf16.msra.mxu1 %v1174_v33 }
 0x721   :  { %v1083_v46 = vpop.f32.mrb[4].mxu1 }
 0x722   :  { %v631_v47 = vadd.f32 %v1083_v46, %v964_v45  ;;  %v625_v48 = vpop.f32.mrb[5].mxu1 }
 0x723   :  { %v626_v49 = vadd.f32 %v964_v45, %v625_v48 }
 0x724   :  { %v635_v50 = vadd.f32 %v631_v47, %v1416_v19 }
 0x725   :  { %v634_v51 = vadd.f32 %v626_v49, %v1414_v18  ;;  %v68_v18 = vld [vmem:[#allocation5 + $0x50] sm:$0xff] }
 0x726   :  { %v639_v52 = vsel %vm189_vm1, %v635_v50, 0.0  ;;  %v1154_v0 = vpack.c.bf16 %v69_v63, %v68_v18 }
 0x727   :  { %640 = vadd.xlane.f32.xlu1 %v639_v52  ;;  %v636_v53 = vsel %vm189_vm1, %v634_v51, 0.0 }
 0x728   :  { %637 = vadd.xlane.f32.xlu0 %v636_v53  ;;  %1155 = vmatprep.subr.bf16.mxu0 %v1154_v0 }
 0x729   :  { %1157 = vmatpush3.bf16.msra.mxu0 %v1154_v0 }
 0x72a   :  { %1159 = vmatprep.subr.bf16.mxu0 %v1158_v3 }
 0x72d   :  { %1161 = vmatpush3.bf16.msra.mxu0 %v1158_v3 }
 0x7b4   :  { %v641_v54 = vpop.xlane.xlu1 %640 }
 0x7b5   :  { %v644_v55 = vmul.f32 0.03125, %v641_v54  ;;  %v638_v56 = vpop.xlane.xlu0 %637 }
 0x7b6   :  { %v643_v57 = vmul.f32 0.03125, %v638_v56 }
 0x7b7   :  { %v646_v58 = vsub.f32 %v635_v50, %v644_v55 }
 0x7b8   :  { %v645_v59 = vsub.f32 %v634_v51, %v643_v57 }
 0x7b9   :  { %v648_v62 = vmul.f32 %v646_v58, %v646_v58 }
 0x7ba   :  { %v647_v60 = vmul.f32 %v645_v59, %v645_v59 }
 0x7bb   :  { %v652_v19 = vsel %vm189_vm1, %v648_v62, 0.0 }
 0x7bc   :  { %v649_v61 = vsel %vm189_vm1, %v647_v60, 0.0 }
 0x7bd   :  { %650 = vadd.xlane.f32.xlu0 %v649_v61 }
 0x7c1   :  { %653 = vadd.xlane.f32.xlu0 %v652_v19 }
 0x84a   :  { %v651_v13 = vpop.xlane.xlu0 %650 }
 0x84b   :  { %v655_v14 = vmul.f32 0.03125, %v651_v13 }
 0x84d   :  { %v657_v15 = vadd.f32 1e-05, %v655_v14 }
 0x84e   :  { %v654_v16 = vpop.xlane.xlu0 %653 }
 0x84f   :  { %1224 = vrsqrt.f32 %v657_v15  ;;  %v656_v17 = vmul.f32 0.03125, %v654_v16 }
 0x851   :  { %v658_v20 = vadd.f32 1e-05, %v656_v17 }
 0x853   :  { %1226 = vrsqrt.f32 %v658_v20 }
 0x859   :  { %v1225_v21 = vpop.eup %1224 }
 0x85a   :  { %v661_v23 = vmul.f32 %v1225_v21, %v645_v59 }
 0x85c   :  { %v667_v25 = vmul.f32 %v967_v22, %v661_v23 }
 0x85d   :  { %v1227_v26 = vpop.eup %1226 }
 0x85e   :  { %v662_v27 = vmul.f32 %v1227_v26, %v646_v58  ;;  %v673_v28 = vadd.f32 %v968_v24, %v667_v25 }
 0x860   :  { %v668_v29 = vmul.f32 %v967_v22, %v662_v27  ;;  %1092 = vmatprep.mubr.msk.f32.mxu0 %vm189_vm1, %v673_v28 }
 0x862   :  { %v674_v30 = vadd.f32 %v968_v24, %v668_v29 }
 0x864   :  { %1093 = vmatmul.mubr.msk.f32.vlgmr.msra.gmra.mrb[8].mxu0 %vm189_vm1, %v674_v30 }
 0x937   :  { %v1094_v35 = vpop.f32.mrb[8].mxu0 }
 0x938   :  { %v757_v36 = vadd.f32 %v1094_v35, %v969_v34  ;;  %v751_v37 = vpop.f32.mrb[9].mxu0  ;;  %v978_v35 = vld [vmem:[#allocation7 + $0xa] ss:$0 sm:$0xff] }
 0x939   :  { %v752_v38 = vadd.f32 %v969_v34, %v751_v37 }
 0x93a   :  { %v761_v40 = vmax.f32 %v757_v36, 0.0 }
 0x93b   :  { %v760_v39 = vmax.f32 %v752_v38, 0.0 }
 0x93d   :  { %1111 = vmatprep.mubr.msk.f32.mxu1 %vm766_vm3, %v760_v39 }
 0x93e   :  { %1112 = vmatmul.mubr.msk.f32.vlgmr.msra.gmra.mrb[6].mxu1 %vm766_vm3, %v761_v40 }
 0xa11   :  { %v1113_v42 = vpop.f32.mrb[6].mxu1 }
 0xa12   :  { %v845_v43 = vadd.f32 %v1113_v42, %v972_v41  ;;  %v839_v44 = vpop.f32.mrb[7].mxu1 }
 0xa13   :  { %v840_v45 = vadd.f32 %v972_v41, %v839_v44 }
 0xa14   :  { %v849_v46 = vadd.f32 %v845_v43, %v674_v30 }
 0xa15   :  { %v848_v47 = vadd.f32 %v840_v45, %v673_v28 }
 0xa16   :  { %v853_v48 = vsel %vm189_vm1, %v849_v46, 0.0 }
 0xa17   :  { %854 = vadd.xlane.f32.xlu0 %v853_v48  ;;  %v850_v49 = vsel %vm189_vm1, %v848_v47, 0.0 }
 0xa18   :  { %851 = vadd.xlane.f32.xlu1 %v850_v49 }
 0xaa4   :  { %v855_v50 = vpop.xlane.xlu0 %854 }
 0xaa5   :  { %v857_v51 = vmul.f32 0.03125, %v855_v50  ;;  %v852_v52 = vpop.xlane.xlu1 %851 }
 0xaa6   :  { %v856_v53 = vmul.f32 0.03125, %v852_v52 }
 0xaa7   :  { %v859_v54 = vsub.f32 %v849_v46, %v857_v51 }
 0xaa8   :  { %v858_v55 = vsub.f32 %v848_v47, %v856_v53 }
 0xaa9   :  { %v861_v56 = vmul.f32 %v859_v54, %v859_v54 }
 0xaaa   :  { %v860_v57 = vmul.f32 %v858_v55, %v858_v55 }
 0xaab   :  { %v865_v58 = vsel %vm189_vm1, %v861_v56, 0.0 }
 0xaac   :  { %866 = vadd.xlane.f32.xlu0 %v865_v58  ;;  %v862_v59 = vsel %vm189_vm1, %v860_v57, 0.0 }
 0xaad   :  { %863 = vadd.xlane.f32.xlu1 %v862_v59 }
 0xb39   :  { %v867_v60 = vpop.xlane.xlu0 %866 }
 0xb3a   :  { %v869_v61 = vmul.f32 0.03125, %v867_v60  ;;  %v864_v62 = vpop.xlane.xlu1 %863 }
 0xb3b   :  { %v868_v19 = vmul.f32 0.03125, %v864_v62 }
 0xb3c   :  { %v871_v18 = vadd.f32 1e-05, %v869_v61 }
 0xb3d   :  { %v870_v63 = vadd.f32 1e-05, %v868_v19 }
 0xb3e   :  { %1228 = vrsqrt.f32 %v871_v18 }
 0xb3f   :  { %1230 = vrsqrt.f32 %v870_v63 }
 0xb48   :  { %v1229_v0 = vpop.eup %1228 }
 0xb49   :  { %v1231_v2 = vpop.eup %1230  ;;  %v875_v3 = vmul.f32 %v1229_v0, %v859_v54 }
 0xb4a   :  { %v874_v5 = vmul.f32 %v1231_v2, %v858_v55 }
 0xb4b   :  { %v881_v6 = vmul.f32 %v975_v1, %v875_v3 }
 0xb4c   :  { %v880_v7 = vmul.f32 %v975_v1, %v874_v5 }
 0xb4d   :  { %v887_v8 = vadd.f32 %v976_v4, %v881_v6 }
 0xb4e   :  { %v886_v9 = vadd.f32 %v976_v4, %v880_v7 }
 0xb4f   :  { %v891_v10 = vsel %vm189_vm1, %v887_v8, 0.0 }
 0xb50   :  { %892 = vadd.xlane.f32.xlu0 %v891_v10  ;;  %v888_v11 = vsel %vm189_vm1, %v886_v9, 0.0 }
 0xb51   :  { %889 = vadd.xlane.f32.xlu1 %v888_v11 }
 0xbdd   :  { %v893_v12 = vpop.xlane.xlu0 %892 }
 0xbde   :  { %v895_v13 = vmul.f32 0.03125, %v893_v12  ;;  %v890_v14 = vpop.xlane.xlu1 %889 }
 0xbdf   :  { %v894_v15 = vmul.f32 0.03125, %v890_v14 }
 0xbe0   :  { %v897_v16 = vsub.f32 %v887_v8, %v895_v13 }
 0xbe1   :  { %v896_v17 = vsub.f32 %v886_v9, %v894_v15 }
 0xbe2   :  { %v899_v20 = vmul.f32 %v897_v16, %v897_v16 }
 0xbe3   :  { %v898_v21 = vmul.f32 %v896_v17, %v896_v17 }
 0xbe4   :  { %v903_v22 = vsel %vm189_vm1, %v899_v20, 0.0 }
 0xbe5   :  { %904 = vadd.xlane.f32.xlu0 %v903_v22  ;;  %v900_v23 = vsel %vm189_vm1, %v898_v21, 0.0 }
 0xbe6   :  { %901 = vadd.xlane.f32.xlu1 %v900_v23 }
 0xc72   :  { %v905_v24 = vpop.xlane.xlu0 %904 }
 0xc73   :  { %v907_v25 = vmul.f32 0.03125, %v905_v24  ;;  %v902_v26 = vpop.xlane.xlu1 %901 }
 0xc74   :  { %v906_v27 = vmul.f32 0.03125, %v902_v26 }
 0xc75   :  { %v909_v28 = vadd.f32 1e-05, %v907_v25 }
 0xc76   :  { %v908_v29 = vadd.f32 1e-05, %v906_v27 }
 0xc77   :  { %1232 = vrsqrt.f32 %v909_v28 }
 0xc78   :  { %1234 = vrsqrt.f32 %v908_v29 }
 0xc81   :  { %v1233_v30 = vpop.eup %1232 }
 0xc82   :  { %v1235_v32 = vpop.eup %1234  ;;  %v913_v33 = vmul.f32 %v1233_v30, %v897_v16 }
 0xc83   :  { %v912_v34 = vmul.f32 %v1235_v32, %v896_v17 }
 0xc84   :  { %v919_v36 = vmul.f32 %v977_v31, %v913_v33 }
 0xc85   :  { %v918_v37 = vmul.f32 %v977_v31, %v912_v34 }
 0xc86   :  { %v925_v38 = vadd.f32 %v978_v35, %v919_v36 }
 0xc87   :  { %v924_v39 = vadd.f32 %v978_v35, %v918_v37 }
 0xc88   :  { %927 = vst.msk [vmem:[#allocation8 + $0x8] sm:$0xff] %vm189_vm1, %v925_v38 }
 0xc89   :  { %926 = vst.msk [vmem:[#allocation8] sm:$0xff] %vm189_vm1, %v924_v39 }
 0xc8a   :  { %1313 = shalt.err (!%p1310_p0)
}
 0xc8b   :  { %s1314_s4 = scalar_lea.hbm %s1488_s3, 256 }
 0xc8c   :  { %p1315_p1 = scmp.ne.s32.totalorder %s1488_s3, %s1314_s4  ;;  %p1318_p2 = scmp.lt.u32.totalorder %s1314_s4, %s1488_s3 }
 0xc8e   :  { %p1320_p3 = pnand %p1318_p2, %p1315_p1 }
 0xc90   :  { %1323 = shalt.err (!%p1320_p3)
}
 0xc91   :  { %939 = dma.vmem_to_hbm [thread:$0]  %s934_s27, 256, %s1488_s3, [#allocation4], %s1332_s24, %s1332_s24, %s1333_s25  }
 0xc92   :  { %1328 = dma.done.wait [#allocation4], 256  }
 0xc93   :  { %1329 = vsyncadd [#allocation4], 4294967040 }
 0xc94   :  { %943 = vsyncpa [#allocation3], 1 }
 0xc95   :  { %944 = vsyncpa [#allocation6], 1 }
 0xc96   :  { %945 = vsyncpa [#allocation4], 1 }

</bundles_post_ra>
